<compile_context>
chip_gen: v7x
topology: tpu7x:2x2x1
jax: 0.10.0
libtpu: 0.0.40
codegen_flags: <defaults>
</compile_context>

<pallas_src>
import functools

import jax
import jax.numpy as jnp
from jax.experimental import pallas as pl
from jax.experimental.pallas import tpu as pltpu


def _se_pool_kernel(x_ref, sum_ref, *, ts, total_s, tiles_per_part):
    """Accumulate masked per-channel partial sums of one (C, ts) tile into sum_ref."""
    p = pl.program_id(1)
    t = pl.program_id(2)

    @pl.when(t == 0)
    def _():
        sum_ref[...] = jnp.zeros_like(sum_ref)

    xb = x_ref[0].astype(jnp.float32)                              # (C, ts)
    # Logical (unclamped) tile index -> global lane offset; padded / duplicate tiles mask to 0.
    tile_idx = p * tiles_per_part + t
    lane = jax.lax.broadcasted_iota(jnp.int32, xb.shape, 1)
    valid = (tile_idx * ts + lane) < total_s
    xb = jnp.where(valid, xb, 0.0)
    sum_ref[0, 0] += jnp.sum(xb, axis=-1, keepdims=True)           # (C, 1)


def _se_apply_kernel(x_ref, g_ref, o_ref):
    # (C, ts) * (C, 1) broadcast over lanes, in the input dtype (exact for f32, bf16-native on
    # v6e/v7x).  Out-of-bounds lanes of a partial last tile are dropped on store.
    o_ref[0] = (x_ref[0] * g_ref[0]).astype(o_ref.dtype)


def _pick_tile_s(total_s, channels, dtype_bytes, *, target_bytes=2 << 20, vmem_budget=40 << 20):
    """Bytes-based lane-dense tile: one (C, ts) block ~target_bytes, apply-pass VMEM <= budget."""
    if total_s <= 128:
        return total_s                      # full-extent block (always a legal BlockSpec dim)
    ts = (target_bytes // (channels * dtype_bytes)) // 128 * 128
    cap = (vmem_budget // (4 * channels * dtype_bytes)) // 128 * 128
    ts = max(128, min(ts, cap))
    ts = min(ts, (total_s // 128) * 128)    # never exceed the array extent along S
    return int(ts)


def squeeze_excite_forward(x, w1, w2, *, tile_s=None):
    """x: (N, C, D, H, W).  w1: (C//r, C), w2: (C, C//r)  (nn.Linear weights, bias=False)."""
    N, C, D, H, W = x.shape
    S = D * H * W
    dtype_bytes = jnp.dtype(x.dtype).itemsize
    xf = x.reshape(N, C, S)

    ts = int(tile_s) if tile_s is not None else _pick_tile_s(S, C, dtype_bytes)
    num_tiles = pl.cdiv(S, ts)

    # Split the S reduction across 2 partitions so both v7x TensorCores work even when N == 1.
    num_parts = 2 if num_tiles >= 2 else 1
    tiles_per_part = pl.cdiv(num_tiles, num_parts)

    vmem_limit = int(min(48 << 20, max(16 << 20, 6 * C * ts * dtype_bytes + (1 << 20))))

    def x_pool_map(n, p, t):
        idx = p * tiles_per_part + t
        return (n, 0, jnp.minimum(idx, num_tiles - 1))   # clamp keeps the DMA in-bounds; masked

    # Pass 1: per-(sample, partition) channel sums, accumulated in the resident f32 output block.
    partial_sums = pl.pallas_call(
        functools.partial(_se_pool_kernel, ts=ts, total_s=S, tiles_per_part=tiles_per_part),
        out_shape=jax.ShapeDtypeStruct((N, num_parts, C, 1), jnp.float32),
        grid=(N, num_parts, tiles_per_part),
        in_specs=[pl.BlockSpec((1, C, ts), x_pool_map)],
        out_specs=pl.BlockSpec((1, 1, C, 1), lambda n, p, t: (n, p, 0, 0)),
        compiler_params=pltpu.CompilerParams(
            dimension_semantics=("parallel", "parallel", "arbitrary"),
            vmem_limit_bytes=vmem_limit),
    )(xf)

    # Tiny gate in plain XLA, batched over N (proper (N,C)x(C,Cr) matmuls, no in-kernel matvecs).
    sums = jnp.sum(partial_sums, axis=1)[..., 0]                     # (N, C) f32
    mean = sums * (1.0 / float(S))
    h = jnp.maximum(mean @ w1.astype(jnp.float32).T, 0.0)            # (N, Cr)
    gate = jax.nn.sigmoid(h @ w2.astype(jnp.float32).T)              # (N, C) f32
    gate = gate.astype(x.dtype)[..., None]                           # (N, C, 1)

    # Pass 2: broadcast-scale x by the per-(sample, channel) gate; fully parallel grid.
    out = pl.pallas_call(
        _se_apply_kernel,
        out_shape=jax.ShapeDtypeStruct((N, C, S), x.dtype),
        grid=(N, num_tiles),
        in_specs=[
            pl.BlockSpec((1, C, ts), lambda n, s: (n, 0, s)),
            pl.BlockSpec((1, C, 1), lambda n, s: (n, 0, 0)),
        ],
        out_specs=pl.BlockSpec((1, C, ts), lambda n, s: (n, 0, s)),
        compiler_params=pltpu.CompilerParams(
            dimension_semantics=("parallel", "parallel"),
            vmem_limit_bytes=vmem_limit),
    )(xf, gate)

    return out.reshape(N, C, D, H, W)


def squeeze_excite_reference(x, w1, w2):
    """Pure-JAX reference mirroring the PyTorch Squeeze_Excite_Block forward."""
    xf = x.astype(jnp.float32)
    y = jnp.mean(xf, axis=(2, 3, 4))                 # AdaptiveAvgPool3d(1) -> (N, C)
    h = jnp.maximum(y @ w1.astype(jnp.float32).T, 0.0)
    s = jax.nn.sigmoid(h @ w2.astype(jnp.float32).T)
    return (xf * s[:, :, None, None, None]).astype(x.dtype)


if __name__ == "__main__":
    N, C, reduction = 2, 8, 4
    D, H, W = 5, 6, 7            # S = 210: exercises the cdiv grid + masked partial last tile
    Cr = C // reduction

    root = jax.random.PRNGKey(0)
    kx, k1, k2 = jax.random.split(root, 3)
    x = jax.random.normal(kx, (N, C, D, H, W), jnp.float32)
    w1 = jax.random.normal(k1, (Cr, C), jnp.float32) * 0.3
    w2 = jax.random.normal(k2, (C, Cr), jnp.float32) * 0.3

    z = squeeze_excite_forward(x, w1, w2)
    z = jax.block_until_ready(z)

    z_ref = jax.block_until_ready(squeeze_excite_reference(x, w1, w2))
    assert z.shape == (N, C, D, H, W)
    assert jnp.allclose(z, z_ref, atol=1e-5, rtol=1e-5), "mismatch vs pure-JAX reference"

    print("KERNEL_OK")
</pallas_src>

<mosaic_0001>
module attributes {stable_mosaic.version = 11 : i64} {
  func.func @_se_pool_kernel(%arg0: i32, %arg1: i32, %arg2: i32, %arg3: memref<1x8x128xf32, #tpu.memory_space<vmem>>, %arg4: memref<1x1x8x1xf32, #tpu.memory_space<vmem>>) attributes {dimension_semantics = [#tpu.dimension_semantics<parallel>, #tpu.dimension_semantics<parallel>, #tpu.dimension_semantics<arbitrary>], iteration_bounds = array<i64: 2, 2, 1>, scalar_prefetch = 0 : i64, scratch_operands = 0 : i64, tpu.core_type = #tpu.core_type<tc>, window_params = [{transform_indices = @transform_0, window_bounds = array<i64: 1, 8, 128>}, {transform_indices = @transform_1, window_bounds = array<i64: 1, 1, 8, 1>}]} {
    %c0_i32 = arith.constant 0 : i32
    %0 = arith.cmpi eq, %arg2, %c0_i32 : i32
    %1 = arith.extui %0 : i1 to i32
    %c0_i32_0 = arith.constant 0 : i32
    %2 = arith.cmpi ne, %1, %c0_i32_0 : i32
    scf.if %2 {
      %cst_12 = arith.constant 0.000000e+00 : f32
      %23 = vector.broadcast %cst_12 : f32 to vector<1x1x8x1xf32>
      %c0_13 = arith.constant 0 : index
      %c0_14 = arith.constant 0 : index
      %c0_15 = arith.constant 0 : index
      %c0_16 = arith.constant 0 : index
      %24 = vector.load %arg4[%c0_13, %c0_14, %c0_15, %c0_16] : memref<1x1x8x1xf32, #tpu.memory_space<vmem>>, vector<1x1x8x1xf32>
      tpu.vector_store %arg4[%c0_13, %c0_14, %c0_15, %c0_16], %23 {strides = array<i32>} : memref<1x1x8x1xf32, #tpu.memory_space<vmem>>, vector<1x1x8x1xf32>,
    } else {
    }
    %c0 = arith.constant 0 : index
    %c0_1 = arith.constant 0 : index
    %c0_2 = arith.constant 0 : index
    %3 = vector.load %arg3[%c0, %c0_1, %c0_2] : memref<1x8x128xf32, #tpu.memory_space<vmem>>, vector<1x8x128xf32>
    %4 = vector.shape_cast %3 : vector<1x8x128xf32> to vector<8x128xf32>
    %c1_i32 = arith.constant 1 : i32
    %5 = arith.muli %arg1, %c1_i32 : i32
    %6 = arith.addi %5, %arg2 : i32
    %7 = tpu.iota {dimensions = array<i32: 1>} : vector<8x128xi32>
    %c128_i32 = arith.constant 128 : i32
    %8 = arith.muli %6, %c128_i32 : i32
    %9 = vector.broadcast %8 : i32 to vector<8x128xi32>
    %10 = arith.addi %9, %7 : vector<8x128xi32>
    %c210_i32 = arith.constant 210 : i32
    %11 = vector.broadcast %c210_i32 : i32 to vector<8x128xi32>
    %12 = arith.cmpi slt, %10, %11 : vector<8x128xi32>
    %cst = arith.constant 0.000000e+00 : f32
    %13 = vector.broadcast %cst : f32 to vector<8x128xf32>
    %14 = arith.select %12, %4, %13 : vector<8x128xi1>, vector<8x128xf32>
    %c0_3 = arith.constant 0 : index
    %c0_4 = arith.constant 0 : index
    %c0_5 = arith.constant 0 : index
    %c0_6 = arith.constant 0 : index
    %15 = vector.load %arg4[%c0_3, %c0_4, %c0_5, %c0_6] : memref<1x1x8x1xf32, #tpu.memory_space<vmem>>, vector<1x1x8x1xf32>
    %16 = vector.shape_cast %15 : vector<1x1x8x1xf32> to vector<8x1xf32>
    %cst_7 = arith.constant dense<0.000000e+00> : vector<8xf32>
    %17 = vector.multi_reduction <add>, %14, %cst_7 [1] : vector<8x128xf32> to vector<8xf32>
    %18 = vector.shape_cast %17 : vector<8xf32> to vector<8x1xf32>
    %19 = arith.addf %16, %18 : vector<8x1xf32>
    %c0_8 = arith.constant 0 : index
    %c0_9 = arith.constant 0 : index
    %c0_10 = arith.constant 0 : index
    %c0_11 = arith.constant 0 : index
    %20 = vector.load %arg4[%c0_8, %c0_9, %c0_10, %c0_11] : memref<1x1x8x1xf32, #tpu.memory_space<vmem>>, vector<1x1x8x1xf32>
    %21 = vector.shape_cast %20 : vector<1x1x8x1xf32> to vector<8x1xf32>
    %22 = vector.shape_cast %19 : vector<8x1xf32> to vector<1x1x8x1xf32>
    tpu.vector_store %arg4[%c0_8, %c0_9, %c0_10, %c0_11], %22 {strides = array<i32>} : memref<1x1x8x1xf32, #tpu.memory_space<vmem>>, vector<1x1x8x1xf32>,
    return
  }
  func.func @transform_0(%arg0: i32, %arg1: i32, %arg2: i32) -> (i32, i32, i32) {
    %c1_i32 = arith.constant 1 : i32
    %0 = arith.muli %arg1, %c1_i32 : i32
    %1 = arith.addi %0, %arg2 : i32
    %c1_i32_0 = arith.constant 1 : i32
    %2 = arith.minsi %1, %c1_i32_0 : i32
    %c0_i32 = arith.constant 0 : i32
    %c0_i32_1 = arith.constant 0 : i32
    return %arg0, %c0_i32, %2 : i32, i32, i32
  }
  func.func @transform_1(%arg0: i32, %arg1: i32, %arg2: i32) -> (i32, i32, i32, i32) {
    %c0_i32 = arith.constant 0 : i32
    %c0_i32_0 = arith.constant 0 : i32
    %c0_i32_1 = arith.constant 0 : i32
    return %arg0, %arg1, %c0_i32, %c0_i32_0 : i32, i32, i32, i32
  }
}

</mosaic_0001>

<bundles_post_ra>
// kernel: tpu_custom_call.1
= control target key start
LH: loop header
LB: loop body
LE: loop exit
PB: predicated region body
PF: predicated region fallthrough
CT: control target
= control target key end

     0   :  { %6 = vsyncpa [#allocation3], 0  ;;  %s646_s0 = inlined_call_operand.hbm [shape: f32[2,8,210], index: 0, kind: input, shape index: {}]   ;;  %s647_s1 = inlined_call_operand.vmem [shape: f32[2,2,8,1], index: 1, kind: output, shape index: {}]  }
   0x1   :  { %8 = vsyncpa [#allocation3 + $0x1], 0  ;;  %s491_s6 = smov 0   ;;  %s493_s7 = smov 0  }
   0x2   :  { %s495_s8 = smov 0   ;;  %s497_s9 = smov 0  }
   0x3   :  { %s499_s10 = smov 0   ;;  %s501_s11 = smov 0  }
   0x4   :  { %s503_s12 = smov 0   ;;  %s505_s13 = smov 0  }
   0x5 LB: > { %s295_s14 = sadd.s32 4294967295, %s477_s13   ;;  %s29_s15 = sadd.s32 1, %s469_s11  ;;  %s477_s13 = sphi %s505_s13, %s14_s13   ;;  %s473_s12 = sphi %s503_s12, %s659_s12   ;;  %s469_s11 = sphi %s501_s11, %s658_s11   ;;  %s465_s10 = sphi %s499_s10, %s657_s10   ;;  %s461_s9 = sphi %s497_s9, %s656_s9   ;;  %s457_s8 = sphi %s495_s8, %s655_s8   ;;  %s453_s7 = sphi %s493_s7, %s654_s7   ;;  %s449_s6 = sphi %s491_s6, %s653_s6  }
   0x6   : > { %p31_p0 = scmp.ge.s32.totalorder %s29_s15, 2  ;;  %s33_s16 = sadd.s32 1, %s473_s12 }
   0x7   : > { %p38_p1 = scmp.lt.s32.totalorder %s469_s11, 1  ;;  %s48_s17 = sadd.s32 1, %s457_s8 }
   0x8   : > { %s661_s15 = smov (%p31_p0, %s29_s15), 0  ;;  %s663_s16 = smov (!%p31_p0, %s33_s16), %s473_s12 }
   0x9   : > { %s39_s18 = scalar_select %p38_p1, %s469_s11, 1 }
   0xa   : > { %p35_p2 = scmp.ge.s32.totalorder %s663_s16, 2  ;;  %p41_p3 = scmp.lt.s32.totalorder %s661_s15, 1 }
   0xb   : > { %p55_p4 = scmp.ne.s32.totalorder %s457_s8, %s453_s7  ;;  %p56_p5 = scmp.eq.s32.totalorder %s477_s13, 0 }
   0xc   : > { %s665_s16 = smov (%p35_p2, %s663_s16), 0  ;;  %p61_p7 = scmp.ne.s32.totalorder %s453_s7, %s449_s6 }
   0xd   : > { %s42_s19 = scalar_select %p41_p3, %s661_s15, 1 }
   0xe   : > { %s43_s20 = ssub.s32 %s473_s12, %s665_s16  ;;  %p549_p6 = por %p56_p5, %p55_p4 }
   0xf   : > { %s44_s22 = ssub.s32 %s39_s18, %s42_s19  ;;  %p62_p8 = scmp.eq.s32.totalorder %s295_s14, 0 }
  0x10   : > { %s45_s23 = sor.u32 %s44_s22, %s43_s20  ;;  %p315_p11 = scmp.lt.s32.totalorder %s477_s13, 4 }
  0x11   : > { %p46_p9 = scmp.eq.s32.totalorder %s45_s23, 0  ;;  %p555_p10 = por %p62_p8, %p61_p7 }
  0x12   : > { %s113_s26 = sand.u32 1, %s457_s8   ;;  %s300_s27 = sshll.u32 %s473_s12, 1 }
  0x13   : > { %s561_s25 = scalar_select %p46_p9, %s457_s8, %s48_s17  }
  0x14   : > { %s299_s28 = sshll.u32 %s113_s26, 3  ;;  %s125_s29 = sadd.s32 %s300_s27, %s39_s18 }
  0x15   : > { %s301_s30 = sshll.u32 %s125_s29, 7  ;;  %s117_s2 = scalar_lea.vmem [#allocation2], %s299_s28 }
  0x16   : > { %s129_s3 = sshll.u32 %s117_s2, 4  ;;  %s568_s6 = scalar_lea.hbm %s646_s0, %s301_s30  ;;  %s570_s3 = int_to_ptr.vmem [resolvable:$true] %s129_s3 }
  0x17   : > { %p574_p12 = pnand %p315_p11, %p549_p6  ;;  %s114_s17 = scalar_lea.sflag [#allocation3], %s113_s26 }
  0x18   : > { %s381_s18 = scalar_lea.hbm %s568_s6, 128  ;;  %s386_s21 = scalar_lea.hbm %s646_s0, 512 }
  0x19   : > { %p382_p1 = scmp.ne.s32.totalorder %s568_s6, %s381_s18  ;;  %p383_p2 = pneg %p574_p12 }
  0x1a   : > { %p387_p5 = scmp.lt.u32.totalorder %s568_s6, %s646_s0  ;;  %p388_p6 = scmp.lt.u32.totalorder %s386_s21, %s381_s18 }
  0x1b   : > { %p384_p3 = pnand %p383_p2, %p382_p1  ;;  %p390_p8 = scmp.lt.u32.totalorder %s381_s18, %s568_s6 }
  0x1c   : > { %p389_p7 = por %p388_p6, %p387_p5 }
  0x1d   : > { %p385_p4 = pneg %p384_p3 }
  0x1e   : > { %p391_p9 = por %p390_p8, %p389_p7 }
  0x20   : > { %p392_p11 = pnand %p391_p9, %p385_p4 }
  0x22   : > { %395 = shalt.err (!%p392_p11)
}
  0x23   : > { %s396_s26 = scalar_lea.vmem %s570_s3, 128  ;;  %s479_s27 = smov [#allocation2]  }
  0x24   : > { %p397_p1 = scmp.ne.s32.totalorder %s570_s3, %s396_s26  ;;  %s401_s28 = sshll.u32 %s479_s27, 4  ;;  %s402_s28 = int_to_ptr.vmem [resolvable:$false] %s401_s28 }
  0x25   : > { %s403_s29 = scalar_lea.vmem %s402_s28, 256  ;;  %p404_p0 = scmp.lt.s32.totalorder %s570_s3, %s402_s28 }
  0x26   : > { %p399_p3 = pnand %p397_p1, %p383_p2  ;;  %p405_p5 = scmp.lt.s32.totalorder %s403_s29, %s396_s26 }
  0x28   : > { %p400_p13 = pneg %p399_p3  ;;  %p406_p6 = por %p405_p5, %p404_p0 }
  0x2a   : > { %p407_p7 = pnand %p406_p6, %p400_p13 }
  0x2c   : > { %410 = shalt.err (!%p407_p7)
}
  0x2d   : > { %314 = dma.hbm_to_vmem [thread:$0]  (!%p574_p12), %s568_s6, 128, %s570_s3, %s114_s17  }
  0x2e   : > { %p651_p4 = scmp.lt.s32.totalorder %s477_s13, 5  ;;  %p652_p8 = scmp.ge.s32.totalorder %s477_s13, 1 }
  0x30   : > { %p135_p2 = pnand %p652_p8, %p651_p4 }
  0x31   : > { %s140_s30 = sand.u32 (!%p135_p2), 1, %s453_s7  }
  0x32   : > { %138 = sbr.rel (%p135_p2) target bundleno = 211 (0xd3), region = 24  ;;  %s303_s2 = sshll.u32 (!%p135_p2), %s140_s30, 3 }
  0x33   : > { %s141_s4 = scalar_lea.sflag (!%p135_p2), [#allocation3], %s140_s30  ;;  %s144_s5 = scalar_lea.vmem (!%p135_p2), [#allocation2], %s303_s2 }
  0x39   : > { %444 = dma.done.wait (%p555_p10), %s141_s4, 128  }
  0x3a   : > { %446 = vsyncadd (%p555_p10), %s141_s4, 4294967168  ;;  %p169_p12 = scmp.lt.s32.totalorder %s465_s10, 1  ;;  %p171_p13 = scmp.lt.s32.totalorder %s461_s9, 1  ;;  %v185_v0 = vlaneseq  ;;  %vm181_vm0 = vcmask 7168   ;;  %v183_v4 = vld [vmem:[%s144_s5] sm:$0xff]  ;;  %v480_v5 = vmov 0.0  }
  0x3b   : > { %s306_s3 = sshll.u32 %s461_s9, 7 }
  0x3c   : > { %s667_s10 = smov (!%p169_p12, %s465_s10), 1  ;;  %v186_v1 = vand.u32 127, %v185_v0  ;;  %v188_v2 = vstv %s306_s3  ;;  %s669_s9 = smov (!%p171_p13, %s461_s9), 1 }
  0x3d   : > { %s304_s6 = sshll.u32 %s667_s10, 1 }
  0x3e   : > { %v189_v3 = vadd.s32 %v188_v2, %v186_v1  ;;  %s174_s14 = sadd.s32 %s304_s6, %s669_s9 }
  0x3f   : > { %s305_s17 = sshll.u32 %s174_s14, 3 }
  0x40   : > { %vm190_vm1 = vcmp.lt.s32.totalorder %v189_v3, 210  ;;  %s176_s19 = scalar_lea.vmem %s647_s1, %s305_s17 }
  0x41   : > { %182 = vst.msk [vmem:[%s176_s19] sm:$0xff] %vm181_vm0, %v480_v5  ;;  %v191_v6 = vsel %vm190_vm1, %v183_v4, 0.0 }
  0x42   : > { %193 = vadd.xlane.f32.xlu0 %v191_v6 }
  0x48   : > { %v192_v7 = vld [vmem:[%s176_s19] sm:$0xff] }
  0xcf   : > { %v194_v8 = vpop.xlane.xlu0 %193 }
  0xd0   : > { %v195_v9 = vadd.f32 %v194_v8, %v192_v7 }
  0xd2   : > { %197 = vst.msk [vmem:[%s176_s19] sm:$0xff] %vm181_vm0, %v195_v9 }
  0xd3 PF: > { %s14_s13 = sadd.s32 1, %s477_s13   ;;  %s653_s6 = smov %s453_s7 }
  0xd4   : > { %p11_p10 = scmp.ge.s32.totalorder %s14_s13, 6   ;;  %s654_s7 = smov %s457_s8 }
  0xd5   : > { %s655_s8 = smov %s561_s25  ;;  %s656_s9 = smov %s469_s11 }
  0xd6   : > { %s657_s10 = smov %s473_s12  ;;  %s658_s11 = smov %s661_s15 }
  0xd7   : > { %s659_s12 = smov %s665_s16  ;;  %13 = sbr.rel (!%p11_p10) target bundleno = 5 (0x5), region = 68 }
  0xde   :  { %225 = vsyncpa [#allocation3], 1 }
  0xdf   :  { %227 = vsyncpa [#allocation3 + $0x1], 1 }

</bundles_post_ra>
